<compile_context>
chip_gen: v5e
topology: v5e:2x2
jax: 0.10.0
libtpu: 0.0.40
codegen_flags: <defaults>
</compile_context>

<pallas_src>
import functools

import jax
import jax.numpy as jnp
from jax.experimental import pallas as pl
from jax.experimental.pallas import tpu as pltpu

NEG_SLOPE = 0.01   # F.leaky_relu default negative_slope
LANE = 128         # TPU lane width; feature dims are padded to this


def _round_up(x, m):
    return (x + m - 1) // m * m


def _pad2(x, rows, cols):
    return jnp.pad(x, ((0, rows - x.shape[0]), (0, cols - x.shape[1])))


# --------------------------- fully fused kernel -----------------------------
def _fused_forward_kernel(src_ref, dst_ref,
                          xg_ref, xa_ref, e_ref,
                          wg0_ref, bg0_ref, wg1_ref, bg1_ref,
                          wa0_ref, ba0_ref, wfc_ref, bfc_ref,
                          wa1_ref, ba1_ref,
                          o_ref, *, n_pad, e_pad):
    branch = pl.program_id(0)

    # Build gather (E,N) and scatter (N,E) operators in-register from the
    # edge index arrays. Padded edges carry index -1 -> all-zero rows/cols,
    # so they contribute nothing (duplicate edges accumulate, matching DGL
    # sum aggregation).
    lane_nodes = jax.lax.broadcasted_iota(jnp.int32, (e_pad, n_pad), 1)
    g_src = (src_ref[...] == lane_nodes).astype(jnp.float32)        # (E, N)
    sub_nodes = jax.lax.broadcasted_iota(jnp.int32, (n_pad, e_pad), 0)
    s_dst = (dst_ref[...] == sub_nodes).astype(jnp.float32)         # (N, E)

    # ---- act branch (grid step 0): GINEConv -> fc -> GINEConv --------------
    @pl.when(branch == 0)
    def _():
        e_feat = e_ref[...]                                          # (E, F)

        def gine(x, w_ref, b_ref):
            x_src = jnp.dot(g_src, x, preferred_element_type=jnp.float32)
            m = jnp.maximum(x_src + e_feat, 0.0)                     # relu msg
            agg = jnp.dot(s_dst, m, preferred_element_type=jnp.float32)
            return jnp.dot(x + agg, w_ref[...],
                           preferred_element_type=jnp.float32) + b_ref[...]

        h1 = gine(xa_ref[...], wa0_ref, ba0_ref)
        h1 = jnp.dot(h1, wfc_ref[...],
                     preferred_element_type=jnp.float32) + bfc_ref[...]
        h1 = gine(h1, wa1_ref, ba1_ref)
        o_ref[...] = h1                       # lane-dense 128-wide store

    # ---- geo branch (grid step 1): 2x GINConv(eps=0,sum) + leaky_relu ------
    # TODO(synk): nn.Dropout is identity in eval mode; training-mode dropout
    #             is not implemented.
    @pl.when(branch == 1)
    def _():
        eye = (jax.lax.broadcasted_iota(jnp.int32, (n_pad, n_pad), 0)
               == jax.lax.broadcasted_iota(jnp.int32, (n_pad, n_pad), 1)
               ).astype(jnp.float32)
        # fold the GIN self term into the operator: A_I = S @ G + I
        a_i = jnp.dot(s_dst, g_src, preferred_element_type=jnp.float32) + eye

        h2 = xg_ref[...]
        for w_ref, b_ref in ((wg0_ref, bg0_ref), (wg1_ref, bg1_ref)):
            h2 = jnp.dot(a_i, h2, preferred_element_type=jnp.float32)
            h2 = jnp.dot(h2, w_ref[...],
                         preferred_element_type=jnp.float32) + b_ref[...]
            h2 = jnp.where(h2 > 0, h2, NEG_SLOPE * h2)               # leaky
        o_ref[...] = h2                       # lane-dense 128-wide store


def model_forward(params, src, dst, n_feat_geo, nfeat_act, efeat_act):
    """MODEL.forward(g, n_feat_geo, nfeat_act, efeat_act, features='both')."""
    n, in_geo = n_feat_geo.shape
    e = src.shape[0]
    (wg0, bg0), (wg1, bg1) = params["geo"]
    (wa0, ba0), (wa1, ba1) = params["act"]
    wfc, bfc = params["fc"]
    h_act = wa1.shape[1]
    h_geo = wg1.shape[1]

    assert max(in_geo, h_geo, nfeat_act.shape[1], h_act, wfc.shape[1]) <= LANE

    n_pad = _round_up(max(n, 8), 8)
    e_pad = _round_up(max(e, 8), 8)
    f = LANE

    # sparse graph encoding: padded edges get index -1 (never matches a node)
    src_p = jnp.full((e_pad, 1), -1, jnp.int32).at[:e, 0].set(src.astype(jnp.int32))
    dst_p = jnp.full((1, e_pad), -1, jnp.int32).at[0, :e].set(dst.astype(jnp.int32))

    xg = _pad2(n_feat_geo.astype(jnp.float32), n_pad, f)
    xa = _pad2(nfeat_act.astype(jnp.float32), n_pad, f)
    ea = _pad2(efeat_act.astype(jnp.float32), e_pad, f)

    def pw(w):
        return _pad2(w.astype(jnp.float32), f, f)

    def pb(b):
        return _pad2(b.astype(jnp.float32), 1, f)

    args = (src_p, dst_p, xg, xa, ea,
            pw(wg0), pb(bg0), pw(wg1), pb(bg1),
            pw(wa0), pb(ba0), pw(wfc), pb(bfc), pw(wa1), pb(ba1))

    in_specs = [pl.BlockSpec(a.shape, lambda b: (0, 0)) for a in args]
    out_specs = pl.BlockSpec((n_pad, f), lambda b: (0, b))   # branch b -> cols

    # VMEM budget (inputs + output double-buffers + in-kernel temporaries),
    # capped so it is valid on v7x's 64 MiB physical VMEM.
    in_bytes = sum(int(a.size) * a.dtype.itemsize for a in args)
    out_bytes = 4 * n_pad * 2 * f
    tmp_bytes = 4 * (2 * e_pad * n_pad + n_pad * n_pad
                     + 6 * n_pad * f + 2 * e_pad * f)
    vmem_limit = int(min(64 * 1024 * 1024,
                         max(2 * (in_bytes + out_bytes) + 2 * tmp_bytes,
                             4 * 1024 * 1024)))

    flops = (2 * e_pad * n_pad * n_pad                           # A_I build
             + 2 * (2 * n_pad * n_pad * f + 2 * n_pad * f * f)   # geo layers
             + 2 * (4 * e_pad * n_pad * f + 2 * n_pad * f * f)   # GINE layers
             + 2 * n_pad * f * f)                                # fc
    cost = pl.CostEstimate(flops=int(flops), transcendentals=0,
                           bytes_accessed=int(in_bytes + out_bytes))

    kernel = functools.partial(_fused_forward_kernel, n_pad=n_pad, e_pad=e_pad)
    out = pl.pallas_call(
        kernel,
        out_shape=jax.ShapeDtypeStruct((n_pad, 2 * f), jnp.float32),
        grid=(2,),                                   # {act, geo} branch axis
        in_specs=in_specs,
        out_specs=out_specs,
        compiler_params=pltpu.CompilerParams(
            dimension_semantics=("parallel",),       # v7x: one branch per TC
            vmem_limit_bytes=vmem_limit),
        cost_estimate=cost,
    )(*args)

    # fused concat lives in lane-aligned column blocks [0,128) and [128,256);
    # slice the real widths back out (matches torch.cat([h1, h2], axis=1)).
    h1 = out[:n, :h_act]
    h2 = out[:n, f:f + h_geo]
    return jnp.concatenate([h1, h2], axis=1)


# ---------- parameter init (deterministic, PyTorch-Linear-style uniform) ----
def _init_linear(key, fan_in, fan_out):
    kw, kb = jax.random.split(key)
    bound = 1.0 / jnp.sqrt(float(fan_in))
    w = jax.random.uniform(kw, (fan_in, fan_out), jnp.float32, -bound, bound)
    b = jax.random.uniform(kb, (1, fan_out), jnp.float32, -bound, bound)
    return w, b


def init_params(key, in_geo, h_geo, in_act, h_act):
    keys = jax.random.split(key, 5)
    return {
        "geo": [_init_linear(keys[0], in_geo, h_geo),
                _init_linear(keys[1], h_geo, h_geo)],
        "act": [_init_linear(keys[2], in_act, h_act),
                _init_linear(keys[3], in_act, h_act)],
        "fc": _init_linear(keys[4], h_act, in_act),
    }


# ---------- pure-JAX reference for correctness check ------------------------
def reference_forward(params, src, dst, n_feat_geo, nfeat_act, efeat_act):
    n = n_feat_geo.shape[0]
    gather = jax.nn.one_hot(src, n, dtype=jnp.float32)       # (E, N)
    scatter = jax.nn.one_hot(dst, n, dtype=jnp.float32).T    # (N, E)
    adj = scatter @ gather                                    # (N, N)

    def leaky(x):
        return jnp.where(x > 0, x, NEG_SLOPE * x)

    h2 = n_feat_geo
    for w, b in params["geo"]:
        h2 = leaky((h2 + adj @ h2) @ w + b)

    def gine(x, ef, w, b):
        m = jnp.maximum(gather @ x + ef, 0.0)
        return (x + scatter @ m) @ w + b

    w0, b0 = params["act"][0]
    h1 = gine(nfeat_act, efeat_act, w0, b0)
    h1 = h1 @ params["fc"][0] + params["fc"][1]
    wl, bl = params["act"][-1]
    h1 = gine(h1, efeat_act, wl, bl)
    return jnp.concatenate([h1, h2], axis=1)


if __name__ == "__main__":
    # small, forward-consistent shapes
    N, E = 16, 48                 # nodes, edges
    IN_GEO, H_GEO = 8, 16
    IN_ACT, H_ACT = 8, 16         # edge feat dim must equal IN_ACT for GINE

    root = jax.random.PRNGKey(0)
    k_graph, k_ngeo, k_nact, k_eact, k_params = jax.random.split(root, 5)

    # deterministic random graph as sparse src/dst edge index arrays
    k_src, k_dst = jax.random.split(k_graph)
    src = jax.random.randint(k_src, (E,), 0, N)
    dst = jax.random.randint(k_dst, (E,), 0, N)

    n_feat_geo = jax.random.normal(k_ngeo, (N, IN_GEO), jnp.float32)
    nfeat_act = jax.random.normal(k_nact, (N, IN_ACT), jnp.float32)
    efeat_act = jax.random.normal(k_eact, (E, IN_ACT), jnp.float32)

    params = init_params(k_params, IN_GEO, H_GEO, IN_ACT, H_ACT)

    fwd = jax.jit(model_forward)
    out = jax.block_until_ready(
        fwd(params, src, dst, n_feat_geo, nfeat_act, efeat_act))

    ref = reference_forward(params, src, dst,
                            n_feat_geo, nfeat_act, efeat_act)
    assert out.shape == (N, H_ACT + H_GEO), out.shape
    err = float(jnp.max(jnp.abs(out - ref)))
    assert jnp.allclose(out, ref, atol=1e-4, rtol=1e-4), err

    print("KERNEL_OK")
</pallas_src>

<mosaic_0001>
module attributes {stable_mosaic.version = 11 : i64} {
  func.func @_fused_forward_kernel(%arg0: i32, %arg1: memref<48x1xi32, #tpu.memory_space<vmem>>, %arg2: memref<1x48xi32, #tpu.memory_space<vmem>>, %arg3: memref<16x128xf32, #tpu.memory_space<vmem>>, %arg4: memref<16x128xf32, #tpu.memory_space<vmem>>, %arg5: memref<48x128xf32, #tpu.memory_space<vmem>>, %arg6: memref<128x128xf32, #tpu.memory_space<vmem>>, %arg7: memref<1x128xf32, #tpu.memory_space<vmem>>, %arg8: memref<128x128xf32, #tpu.memory_space<vmem>>, %arg9: memref<1x128xf32, #tpu.memory_space<vmem>>, %arg10: memref<128x128xf32, #tpu.memory_space<vmem>>, %arg11: memref<1x128xf32, #tpu.memory_space<vmem>>, %arg12: memref<128x128xf32, #tpu.memory_space<vmem>>, %arg13: memref<1x128xf32, #tpu.memory_space<vmem>>, %arg14: memref<128x128xf32, #tpu.memory_space<vmem>>, %arg15: memref<1x128xf32, #tpu.memory_space<vmem>>, %arg16: memref<16x128xf32, #tpu.memory_space<vmem>>) attributes {dimension_semantics = [#tpu.dimension_semantics<parallel>], iteration_bounds = array<i64: 2>, scalar_prefetch = 0 : i64, scratch_operands = 0 : i64, tpu.core_type = #tpu.core_type<tc>, window_params = [{pipeline_mode = #tpu.pipeline_mode<synchronous>, transform_indices = @transform_0, window_bounds = array<i64: 48, 1>}, {pipeline_mode = #tpu.pipeline_mode<synchronous>, transform_indices = @transform_1, window_bounds = array<i64: 1, 48>}, {pipeline_mode = #tpu.pipeline_mode<synchronous>, transform_indices = @transform_2, window_bounds = array<i64: 16, 128>}, {pipeline_mode = #tpu.pipeline_mode<synchronous>, transform_indices = @transform_3, window_bounds = array<i64: 16, 128>}, {pipeline_mode = #tpu.pipeline_mode<synchronous>, transform_indices = @transform_4, window_bounds = array<i64: 48, 128>}, {pipeline_mode = #tpu.pipeline_mode<synchronous>, transform_indices = @transform_5, window_bounds = array<i64: 128, 128>}, {pipeline_mode = #tpu.pipeline_mode<synchronous>, transform_indices = @transform_6, window_bounds = array<i64: 1, 128>}, {pipeline_mode = #tpu.pipeline_mode<synchronous>, transform_indices = @transform_7, window_bounds = array<i64: 128, 128>}, {pipeline_mode = #tpu.pipeline_mode<synchronous>, transform_indices = @transform_8, window_bounds = array<i64: 1, 128>}, {pipeline_mode = #tpu.pipeline_mode<synchronous>, transform_indices = @transform_9, window_bounds = array<i64: 128, 128>}, {pipeline_mode = #tpu.pipeline_mode<synchronous>, transform_indices = @transform_10, window_bounds = array<i64: 1, 128>}, {pipeline_mode = #tpu.pipeline_mode<synchronous>, transform_indices = @transform_11, window_bounds = array<i64: 128, 128>}, {pipeline_mode = #tpu.pipeline_mode<synchronous>, transform_indices = @transform_12, window_bounds = array<i64: 1, 128>}, {pipeline_mode = #tpu.pipeline_mode<synchronous>, transform_indices = @transform_13, window_bounds = array<i64: 128, 128>}, {pipeline_mode = #tpu.pipeline_mode<synchronous>, transform_indices = @transform_14, window_bounds = array<i64: 1, 128>}, {transform_indices = @transform_15, window_bounds = array<i64: 16, 128>}]} {
    %0 = tpu.iota {dimensions = array<i32: 1>} : vector<48x16xi32>
    %c0 = arith.constant 0 : index
    %c0_0 = arith.constant 0 : index
    %1 = vector.load %arg1[%c0, %c0_0] : memref<48x1xi32, #tpu.memory_space<vmem>>, vector<48x1xi32>
    %2 = vector.broadcast %1 : vector<48x1xi32> to vector<48x16xi32>
    %3 = arith.cmpi eq, %2, %0 : vector<48x16xi32>
    %4 = arith.extui %3 : vector<48x16xi1> to vector<48x16xi32>
    %5 = arith.sitofp %4 : vector<48x16xi32> to vector<48x16xf32>
    %6 = tpu.iota {dimensions = array<i32: 0>} : vector<16x48xi32>
    %c0_1 = arith.constant 0 : index
    %c0_2 = arith.constant 0 : index
    %7 = vector.load %arg2[%c0_1, %c0_2] : memref<1x48xi32, #tpu.memory_space<vmem>>, vector<1x48xi32>
    %8 = vector.broadcast %7 : vector<1x48xi32> to vector<16x48xi32>
    %9 = arith.cmpi eq, %8, %6 : vector<16x48xi32>
    %10 = arith.extui %9 : vector<16x48xi1> to vector<16x48xi32>
    %11 = arith.sitofp %10 : vector<16x48xi32> to vector<16x48xf32>
    %c0_i32 = arith.constant 0 : i32
    %12 = arith.cmpi eq, %arg0, %c0_i32 : i32
    %13 = arith.extui %12 : i1 to i32
    %c0_i32_3 = arith.constant 0 : i32
    %14 = arith.cmpi ne, %13, %c0_i32_3 : i32
    scf.if %14 {
      %c0_5 = arith.constant 0 : index
      %c0_6 = arith.constant 0 : index
      %18 = vector.load %arg5[%c0_5, %c0_6] : memref<48x128xf32, #tpu.memory_space<vmem>>, vector<48x128xf32>
      %c0_7 = arith.constant 0 : index
      %c0_8 = arith.constant 0 : index
      %19 = vector.load %arg4[%c0_7, %c0_8] : memref<16x128xf32, #tpu.memory_space<vmem>>, vector<16x128xf32>
      %cst = arith.constant dense<0.000000e+00> : vector<48x128xf32>
      %20 = tpu.matmul %5, %19, %cst {dimension_numbers = #tpu.dot_dimension_numbers<[1], [0], [0], [1], [0, 0, 1, 1], [], []>} : vector<48x16xf32>, vector<16x128xf32>, vector<48x128xf32> -> vector<48x128xf32>
      %21 = arith.addf %20, %18 : vector<48x128xf32>
      %cst_9 = arith.constant 0.000000e+00 : f32
      %22 = vector.broadcast %cst_9 : f32 to vector<48x128xf32>
      %23 = arith.maximumf %21, %22 : vector<48x128xf32>
      %cst_10 = arith.constant dense<0.000000e+00> : vector<16x128xf32>
      %24 = tpu.matmul %11, %23, %cst_10 {dimension_numbers = #tpu.dot_dimension_numbers<[1], [0], [0], [1], [0, 0, 1, 1], [], []>} : vector<16x48xf32>, vector<48x128xf32>, vector<16x128xf32> -> vector<16x128xf32>
      %25 = arith.addf %19, %24 : vector<16x128xf32>
      %c0_11 = arith.constant 0 : index
      %c0_12 = arith.constant 0 : index
      %26 = vector.load %arg10[%c0_11, %c0_12] : memref<128x128xf32, #tpu.memory_space<vmem>>, vector<128x128xf32>
      %cst_13 = arith.constant dense<0.000000e+00> : vector<16x128xf32>
      %27 = tpu.matmul %25, %26, %cst_13 {dimension_numbers = #tpu.dot_dimension_numbers<[1], [0], [0], [1], [0, 0, 1, 1], [], []>} : vector<16x128xf32>, vector<128x128xf32>, vector<16x128xf32> -> vector<16x128xf32>
      %c0_14 = arith.constant 0 : index
      %c0_15 = arith.constant 0 : index
      %28 = vector.load %arg11[%c0_14, %c0_15] : memref<1x128xf32, #tpu.memory_space<vmem>>, vector<1x128xf32>
      %29 = vector.broadcast %28 : vector<1x128xf32> to vector<16x128xf32>
      %30 = arith.addf %27, %29 : vector<16x128xf32>
      %c0_16 = arith.constant 0 : index
      %c0_17 = arith.constant 0 : index
      %31 = vector.load %arg12[%c0_16, %c0_17] : memref<128x128xf32, #tpu.memory_space<vmem>>, vector<128x128xf32>
      %cst_18 = arith.constant dense<0.000000e+00> : vector<16x128xf32>
      %32 = tpu.matmul %30, %31, %cst_18 {dimension_numbers = #tpu.dot_dimension_numbers<[1], [0], [0], [1], [0, 0, 1, 1], [], []>} : vector<16x128xf32>, vector<128x128xf32>, vector<16x128xf32> -> vector<16x128xf32>
      %c0_19 = arith.constant 0 : index
      %c0_20 = arith.constant 0 : index
      %33 = vector.load %arg13[%c0_19, %c0_20] : memref<1x128xf32, #tpu.memory_space<vmem>>, vector<1x128xf32>
      %34 = vector.broadcast %33 : vector<1x128xf32> to vector<16x128xf32>
      %35 = arith.addf %32, %34 : vector<16x128xf32>
      %cst_21 = arith.constant dense<0.000000e+00> : vector<48x128xf32>
      %36 = tpu.matmul %5, %35, %cst_21 {dimension_numbers = #tpu.dot_dimension_numbers<[1], [0], [0], [1], [0, 0, 1, 1], [], []>} : vector<48x16xf32>, vector<16x128xf32>, vector<48x128xf32> -> vector<48x128xf32>
      %37 = arith.addf %36, %18 : vector<48x128xf32>
      %cst_22 = arith.constant 0.000000e+00 : f32
      %38 = vector.broadcast %cst_22 : f32 to vector<48x128xf32>
      %39 = arith.maximumf %37, %38 : vector<48x128xf32>
      %cst_23 = arith.constant dense<0.000000e+00> : vector<16x128xf32>
      %40 = tpu.matmul %11, %39, %cst_23 {dimension_numbers = #tpu.dot_dimension_numbers<[1], [0], [0], [1], [0, 0, 1, 1], [], []>} : vector<16x48xf32>, vector<48x128xf32>, vector<16x128xf32> -> vector<16x128xf32>
      %41 = arith.addf %35, %40 : vector<16x128xf32>
      %c0_24 = arith.constant 0 : index
      %c0_25 = arith.constant 0 : index
      %42 = vector.load %arg14[%c0_24, %c0_25] : memref<128x128xf32, #tpu.memory_space<vmem>>, vector<128x128xf32>
      %cst_26 = arith.constant dense<0.000000e+00> : vector<16x128xf32>
      %43 = tpu.matmul %41, %42, %cst_26 {dimension_numbers = #tpu.dot_dimension_numbers<[1], [0], [0], [1], [0, 0, 1, 1], [], []>} : vector<16x128xf32>, vector<128x128xf32>, vector<16x128xf32> -> vector<16x128xf32>
      %c0_27 = arith.constant 0 : index
      %c0_28 = arith.constant 0 : index
      %44 = vector.load %arg15[%c0_27, %c0_28] : memref<1x128xf32, #tpu.memory_space<vmem>>, vector<1x128xf32>
      %45 = vector.broadcast %44 : vector<1x128xf32> to vector<16x128xf32>
      %46 = arith.addf %43, %45 : vector<16x128xf32>
      %c0_29 = arith.constant 0 : index
      %c0_30 = arith.constant 0 : index
      %47 = vector.load %arg16[%c0_29, %c0_30] : memref<16x128xf32, #tpu.memory_space<vmem>>, vector<16x128xf32>
      tpu.vector_store %arg16[%c0_29, %c0_30], %46 {strides = array<i32>} : memref<16x128xf32, #tpu.memory_space<vmem>>, vector<16x128xf32>,
    } else {
    }
    %c1_i32 = arith.constant 1 : i32
    %15 = arith.cmpi eq, %arg0, %c1_i32 : i32
    %16 = arith.extui %15 : i1 to i32
    %c0_i32_4 = arith.constant 0 : i32
    %17 = arith.cmpi ne, %16, %c0_i32_4 : i32
    scf.if %17 {
      %18 = tpu.iota {dimensions = array<i32: 0>} : vector<16x16xi32>
      %19 = tpu.iota {dimensions = array<i32: 1>} : vector<16x16xi32>
      %20 = arith.cmpi eq, %18, %19 : vector<16x16xi32>
      %21 = arith.extui %20 : vector<16x16xi1> to vector<16x16xi32>
      %22 = arith.sitofp %21 : vector<16x16xi32> to vector<16x16xf32>
      %cst = arith.constant dense<0.000000e+00> : vector<16x16xf32>
      %23 = tpu.matmul %11, %5, %cst {dimension_numbers = #tpu.dot_dimension_numbers<[1], [0], [0], [1], [0, 0, 1, 1], [], []>} : vector<16x48xf32>, vector<48x16xf32>, vector<16x16xf32> -> vector<16x16xf32>
      %24 = arith.addf %23, %22 : vector<16x16xf32>
      %c0_5 = arith.constant 0 : index
      %c0_6 = arith.constant 0 : index
      %25 = vector.load %arg3[%c0_5, %c0_6] : memref<16x128xf32, #tpu.memory_space<vmem>>, vector<16x128xf32>
      %cst_7 = arith.constant dense<0.000000e+00> : vector<16x128xf32>
      %26 = tpu.matmul %24, %25, %cst_7 {dimension_numbers = #tpu.dot_dimension_numbers<[1], [0], [0], [1], [0, 0, 1, 1], [], []>} : vector<16x16xf32>, vector<16x128xf32>, vector<16x128xf32> -> vector<16x128xf32>
      %c0_8 = arith.constant 0 : index
      %c0_9 = arith.constant 0 : index
      %27 = vector.load %arg6[%c0_8, %c0_9] : memref<128x128xf32, #tpu.memory_space<vmem>>, vector<128x128xf32>
      %cst_10 = arith.constant dense<0.000000e+00> : vector<16x128xf32>
      %28 = tpu.matmul %26, %27, %cst_10 {dimension_numbers = #tpu.dot_dimension_numbers<[1], [0], [0], [1], [0, 0, 1, 1], [], []>} : vector<16x128xf32>, vector<128x128xf32>, vector<16x128xf32> -> vector<16x128xf32>
      %c0_11 = arith.constant 0 : index
      %c0_12 = arith.constant 0 : index
      %29 = vector.load %arg7[%c0_11, %c0_12] : memref<1x128xf32, #tpu.memory_space<vmem>>, vector<1x128xf32>
      %30 = vector.broadcast %29 : vector<1x128xf32> to vector<16x128xf32>
      %31 = arith.addf %28, %30 : vector<16x128xf32>
      %cst_13 = arith.constant 0.000000e+00 : f32
      %32 = vector.broadcast %cst_13 : f32 to vector<16x128xf32>
      %33 = arith.cmpf ogt, %31, %32 : vector<16x128xf32>
      %cst_14 = arith.constant 0.00999999977 : f32
      %34 = vector.broadcast %cst_14 : f32 to vector<16x128xf32>
      %35 = arith.mulf %34, %31 : vector<16x128xf32>
      %36 = arith.select %33, %31, %35 : vector<16x128xi1>, vector<16x128xf32>
      %cst_15 = arith.constant dense<0.000000e+00> : vector<16x128xf32>
      %37 = tpu.matmul %24, %36, %cst_15 {dimension_numbers = #tpu.dot_dimension_numbers<[1], [0], [0], [1], [0, 0, 1, 1], [], []>} : vector<16x16xf32>, vector<16x128xf32>, vector<16x128xf32> -> vector<16x128xf32>
      %c0_16 = arith.constant 0 : index
      %c0_17 = arith.constant 0 : index
      %38 = vector.load %arg8[%c0_16, %c0_17] : memref<128x128xf32, #tpu.memory_space<vmem>>, vector<128x128xf32>
      %cst_18 = arith.constant dense<0.000000e+00> : vector<16x128xf32>
      %39 = tpu.matmul %37, %38, %cst_18 {dimension_numbers = #tpu.dot_dimension_numbers<[1], [0], [0], [1], [0, 0, 1, 1], [], []>} : vector<16x128xf32>, vector<128x128xf32>, vector<16x128xf32> -> vector<16x128xf32>
      %c0_19 = arith.constant 0 : index
      %c0_20 = arith.constant 0 : index
      %40 = vector.load %arg9[%c0_19, %c0_20] : memref<1x128xf32, #tpu.memory_space<vmem>>, vector<1x128xf32>
      %41 = vector.broadcast %40 : vector<1x128xf32> to vector<16x128xf32>
      %42 = arith.addf %39, %41 : vector<16x128xf32>
      %cst_21 = arith.constant 0.000000e+00 : f32
      %43 = vector.broadcast %cst_21 : f32 to vector<16x128xf32>
      %44 = arith.cmpf ogt, %42, %43 : vector<16x128xf32>
      %cst_22 = arith.constant 0.00999999977 : f32
      %45 = vector.broadcast %cst_22 : f32 to vector<16x128xf32>
      %46 = arith.mulf %45, %42 : vector<16x128xf32>
      %47 = arith.select %44, %42, %46 : vector<16x128xi1>, vector<16x128xf32>
      %c0_23 = arith.constant 0 : index
      %c0_24 = arith.constant 0 : index
      %48 = vector.load %arg16[%c0_23, %c0_24] : memref<16x128xf32, #tpu.memory_space<vmem>>, vector<16x128xf32>
      tpu.vector_store %arg16[%c0_23, %c0_24], %47 {strides = array<i32>} : memref<16x128xf32, #tpu.memory_space<vmem>>, vector<16x128xf32>,
    } else {
    }
    return
  }
  func.func @transform_0(%arg0: i32) -> (i32, i32) {
    %c0_i32 = arith.constant 0 : i32
    %c0_i32_0 = arith.constant 0 : i32
    %c0_i32_1 = arith.constant 0 : i32
    return %c0_i32, %c0_i32_0 : i32, i32
  }
  func.func @transform_1(%arg0: i32) -> (i32, i32) {
    %c0_i32 = arith.constant 0 : i32
    %c0_i32_0 = arith.constant 0 : i32
    %c0_i32_1 = arith.constant 0 : i32
    return %c0_i32, %c0_i32_0 : i32, i32
  }
  func.func @transform_2(%arg0: i32) -> (i32, i32) {
    %c0_i32 = arith.constant 0 : i32
    %c0_i32_0 = arith.constant 0 : i32
    %c0_i32_1 = arith.constant 0 : i32
    return %c0_i32, %c0_i32_0 : i32, i32
  }
  func.func @transform_3(%arg0: i32) -> (i32, i32) {
    %c0_i32 = arith.constant 0 : i32
    %c0_i32_0 = arith.constant 0 : i32
    %c0_i32_1 = arith.constant 0 : i32
    return %c0_i32, %c0_i32_0 : i32, i32
  }
  func.func @transform_4(%arg0: i32) -> (i32, i32) {
    %c0_i32 = arith.constant 0 : i32
    %c0_i32_0 = arith.constant 0 : i32
    %c0_i32_1 = arith.constant 0 : i32
    return %c0_i32, %c0_i32_0 : i32, i32
  }
  func.func @transform_5(%arg0: i32) -> (i32, i32) {
    %c0_i32 = arith.constant 0 : i32
    %c0_i32_0 = arith.constant 0 : i32
    %c0_i32_1 = arith.constant 0 : i32
    return %c0_i32, %c0_i32_0 : i32, i32
  }
  func.func @transform_6(%arg0: i32) -> (i32, i32) {
    %c0_i32 = arith.constant 0 : i32
    %c0_i32_0 = arith.constant 0 : i32
    %c0_i32_1 = arith.constant 0 : i32
    return %c0_i32, %c0_i32_0 : i32, i32
  }
  func.func @transform_7(%arg0: i32) -> (i32, i32) {
    %c0_i32 = arith.constant 0 : i32
    %c0_i32_0 = arith.constant 0 : i32
    %c0_i32_1 = arith.constant 0 : i32
    return %c0_i32, %c0_i32_0 : i32, i32
  }
  func.func @transform_8(%arg0: i32) -> (i32, i32) {
    %c0_i32 = arith.constant 0 : i32
    %c0_i32_0 = arith.constant 0 : i32
    %c0_i32_1 = arith.constant 0 : i32
    return %c0_i32, %c0_i32_0 : i32, i32
  }
  func.func @transform_9(%arg0: i32) -> (i32, i32) {
    %c0_i32 = arith.constant 0 : i32
    %c0_i32_0 = arith.constant 0 : i32
    %c0_i32_1 = arith.constant 0 : i32
    return %c0_i32, %c0_i32_0 : i32, i32
  }
  func.func @transform_10(%arg0: i32) -> (i32, i32) {
    %c0_i32 = arith.constant 0 : i32
    %c0_i32_0 = arith.constant 0 : i32
    %c0_i32_1 = arith.constant 0 : i32
    return %c0_i32, %c0_i32_0 : i32, i32
  }
  func.func @transform_11(%arg0: i32) -> (i32, i32) {
    %c0_i32 = arith.constant 0 : i32
    %c0_i32_0 = arith.constant 0 : i32
    %c0_i32_1 = arith.constant 0 : i32
    return %c0_i32, %c0_i32_0 : i32, i32
  }
  func.func @transform_12(%arg0: i32) -> (i32, i32) {
    %c0_i32 = arith.constant 0 : i32
    %c0_i32_0 = arith.constant 0 : i32
    %c0_i32_1 = arith.constant 0 : i32
    return %c0_i32, %c0_i32_0 : i32, i32
  }
  func.func @transform_13(%arg0: i32) -> (i32, i32) {
    %c0_i32 = arith.constant 0 : i32
    %c0_i32_0 = arith.constant 0 : i32
    %c0_i32_1 = arith.constant 0 : i32
    return %c0_i32, %c0_i32_0 : i32, i32
  }
  func.func @transform_14(%arg0: i32) -> (i32, i32) {
    %c0_i32 = arith.constant 0 : i32
    %c0_i32_0 = arith.constant 0 : i32
    %c0_i32_1 = arith.constant 0 : i32
    return %c0_i32, %c0_i32_0 : i32, i32
  }
  func.func @transform_15(%arg0: i32) -> (i32, i32) {
    %c0_i32 = arith.constant 0 : i32
    %c0_i32_0 = arith.constant 0 : i32
    return %c0_i32, %arg0 : i32, i32
  }
}

</mosaic_0001>

<bundles_post_ra>
// kernel: model_forward.1
= control target key start
LH: loop header
LB: loop body
LE: loop exit
PB: predicated region body
PF: predicated region fallthrough
CT: control target
= control target key end

     0   :  { %s1858_s0 = inlined_call_operand.vmem [shape: s32[48,1], index: 0, kind: input, shape index: {}]   ;;  %s1859_s1 = inlined_call_operand.vmem [shape: s32[1,48], index: 1, kind: input, shape index: {}]   ;;  %s1860_s2 = inlined_call_operand.vmem [shape: f32[16,128], index: 2, kind: input, shape index: {}]   ;;  %s1861_s3 = inlined_call_operand.vmem [shape: f32[16,128], index: 3, kind: input, shape index: {}]   ;;  %s1862_s4 = inlined_call_operand.vmem [shape: f32[48,128], index: 4, kind: input, shape index: {}]   ;;  %s1863_s5 = inlined_call_operand.vmem [shape: f32[128,128], index: 5, kind: input, shape index: {}]   ;;  %s1864_s6 = inlined_call_operand.vmem [shape: f32[1,128], index: 6, kind: input, shape index: {}]   ;;  %s1865_s7 = inlined_call_operand.vmem [shape: f32[128,128], index: 7, kind: input, shape index: {}]   ;;  %s1866_s8 = inlined_call_operand.vmem [shape: f32[1,128], index: 8, kind: input, shape index: {}]   ;;  %s1867_s9 = inlined_call_operand.vmem [shape: f32[128,128], index: 9, kind: input, shape index: {}]   ;;  %s1868_s10 = inlined_call_operand.vmem [shape: f32[1,128], index: 10, kind: input, shape index: {}]   ;;  %s1869_s11 = inlined_call_operand.vmem [shape: f32[128,128], index: 11, kind: input, shape index: {}]   ;;  %s1870_s12 = inlined_call_operand.vmem [shape: f32[1,128], index: 12, kind: input, shape index: {}]   ;;  %s1871_s13 = inlined_call_operand.vmem [shape: f32[128,128], index: 13, kind: input, shape index: {}]   ;;  %s1872_s14 = inlined_call_operand.vmem [shape: f32[1,128], index: 14, kind: input, shape index: {}]   ;;  %s1873_s15 = inlined_call_operand.vmem [shape: f32[16,256], index: 15, kind: output, shape index: {}]  }
   0x1   :  { %1874 = sst [smem:[#allocation3_spill]] %s1858_s0 }
   0x2   :  { %s1330_s18 = smov 0   ;;  %s1332_s19 = smov 0  }
   0x3   :  { %s1334_s20 = smov 0  }
   0x4 LB: > { %s1341_s21 = sadd.s32 4294967295, %s1244_s20   ;;  %s1343_s22 = sadd.s32 1, %s1244_s20   ;;  %s1244_s20 = sphi %s1334_s20, %s1879_s20   ;;  %s1240_s19 = sphi %s1332_s19, %s1878_s19   ;;  %s1236_s18 = sphi %s1330_s18, %s1877_s18  }
   0x5   : > { %s344_s23 = ssub.s32 %s1244_s20, %s1343_s22  ;;  %s347_s24 = sadd.s32 1, %s1240_s19 }
   0x6   : > { %p345_p0 = scmp.eq.s32.totalorder %s344_s23, 0  ;;  %p357_p1 = scmp.ne.s32.totalorder %s1240_s19, %s1236_s18 }
   0x7   : > { %p358_p2 = scmp.eq.s32.totalorder %s1341_s21, 1  ;;  %p1107_p3 = scmp.ge.s32.totalorder %s1244_s20, 1 }
   0x8   : > { %s1350_s25 = scalar_select %p345_p0, %s1240_s19, %s347_s24  }
   0x9   : > { %p1352_p4 = por %p358_p2, %p357_p1  ;;  %p427_p5 = scmp.lt.s32.totalorder %s1244_s20, 3 }
   0xb   : > { %p428_p6 = pnand %p1107_p3, %p427_p5 }
   0xc   : > { %s1876_s0 = sld [smem:[#allocation3_spill]] (!%p428_p6)  ;;  %s466_s16 = sand.u32 (!%p428_p6), 1, %s1236_s18  }
   0xd   : > { %431 = sbr.rel (%p428_p6) target bundleno = 1902 (0x76e), region = 80  ;;  %s1365_s24 = sshll.u32 (!%p428_p6), %s466_s16, 4 }
   0xe   : > { %s1447_s23 = scalar_lea.vmem (!%p428_p6), [#allocation2], %s1365_s24  ;;  %p1117_p7 = scmp.ne.s32.totalorder (!%p428_p6), %s1341_s21, 0 }
  0x12   : > { %v473_v0 = vld [vmem:[%s1876_s0 + $0x10] sm:$0xff]  ;;  %v471_v1 = vld [vmem:[%s1876_s0] sm:$0xff]  ;;  %v1246_v2 = vmov 0   ;;  %v474_v4 = vld [vmem:[%s1876_s0 + $0x18] sm:$0xff]  ;;  %v469_v8 = vlaneseq  ;;  %v1247_v11 = vmov 0.0  }
  0x13   : > { %1214 = vset.pattern.permute.xlu1 %v1246_v2  ;;  %1213 = vset.pattern.permute.xlu0 %v1246_v2  ;;  %v475_v3 = vld [vmem:[%s1876_s0 + $0x20] sm:$0xff]  ;;  %v472_v5 = vld [vmem:[%s1876_s0 + $0x8] sm:$0xff] }
  0x14   : > { %484 = vperm.xlu1 %1214, %v473_v0   ;;  %478 = vperm.xlu0 %1213, %v471_v1   ;;  %v476_v6 = vld [vmem:[%s1876_s0 + $0x28] sm:$0xff]  ;;  %v1216_v7 = vld [vmem:[%s1859_s1] ss:$0 sm:$0xff]  ;;  %v1379_v9 = vshrl.u32 %v469_v8, 7  ;;  %v1390_v14 = vand.u32 127, %v469_v8 }
  0x15   : > { %1215 = vset.pattern.permute.xlu2 %v1246_v2 }
  0x16   : > { %490 = vperm.xlu2 %1215, %v475_v3   ;;  %v1382_v10 = vadd.s32 8, %v1379_v9  ;;  %vm518_vm0 = vcmp.eq.s32.totalorder %v1216_v7, %v1379_v9 }
  0x17   : > { %v1385_v12 = vsel %vm518_vm0, 1.0, %v1247_v11 }
  0x18   : > { %vm519_vm1 = vcmp.eq.s32.totalorder %v1216_v7, %v1382_v10 }
  0x19   : > { %v1388_v13 = vsel %vm519_vm1, 1.0, %v1247_v11 }
  0x1c   : > { %487 = vperm.xlu1 %1214, %v474_v4   ;;  %481 = vperm.xlu0 %1213, %v472_v5  }
  0x1e   : > { %493 = vperm.xlu2 %1215, %v476_v6  }
  0x70   : > { %v1392_v15 = vpop.permute.xlu2 %490 }
  0x71   : > { %vm499_vm2 = vcmp.eq.s32.totalorder %v1392_v15, %v1390_v14 }
  0x72   : > { %v1399_v16 = vsel %vm499_vm2, 1.0, %v1247_v11 }
  0x78   : > { %v1401_v17 = vpop.permute.xlu2 %493 }
  0x79   : > { %vm500_vm3 = vcmp.eq.s32.totalorder %v1401_v17, %v1390_v14 }
  0x7a   : > { %v1408_v18 = vsel %vm500_vm3, 1.0, %v1247_v11 }
  0x86   : > { %v1410_v19 = vpop.permute.xlu1 %484  ;;  %v1412_v20 = vpop.permute.xlu0 %478 }
  0x87   : > { %vm497_vm4 = vcmp.eq.s32.totalorder %v1410_v19, %v1390_v14  ;;  %vm495_vm5 = vcmp.eq.s32.totalorder %v1412_v20, %v1390_v14 }
  0x88   : > { %v1421_v21 = vsel %vm497_vm4, 1.0, %v1247_v11  ;;  %v1426_v22 = vsel %vm495_vm5, 1.0, %v1247_v11 }
  0x8c   : > { %527 = sbr.rel (%p1117_p7) target bundleno = 1195 (0x4ab), region = 84 }
  0x8e   : > { %v1428_v23 = vpop.permute.xlu1 %487  ;;  %v1430_v24 = vpop.permute.xlu0 %481 }
  0x8f   : > { %vm498_vm6 = vcmp.eq.s32.totalorder %v1428_v23, %v1390_v14  ;;  %vm496_vm7 = vcmp.eq.s32.totalorder %v1430_v24, %v1390_v14 }
  0x90   : > { %v1439_v25 = vsel %vm498_vm6, 1.0, %v1247_v11  ;;  %v1444_v26 = vsel %vm496_vm7, 1.0, %v1247_v11 }
  0x91   : > { %v1453_v27 = vld [vmem:[%s1861_s3 + $0x8] sm:$0xff]  ;;  %v1458_v28 = vld [vmem:[%s1861_s3] sm:$0xff]  ;;  %vm536_vm8 = vcmask 130048   ;;  %v643_v34 = vld [vmem:[%s1867_s9 + $0x78] sm:$0xff]  ;;  %vm596_vm9 = vcmask 392192  }
  0x92   : > { %569 = vmatpush.msra.mxu0 %v1453_v27  ;;  %v642_v35 = vld [vmem:[%s1867_s9 + $0x70] sm:$0xff]  ;;  %648 = vmatpush.msra.mxu2 %v643_v34  ;;  %v641_v36 = vld [vmem:[%s1867_s9 + $0x68] sm:$0xff]  ;;  %v640_v37 = vld [vmem:[%s1867_s9 + $0x60] sm:$0xff] }
  0x93   : > { %v1489_v38 = vld [vmem:[%s1862_s4 + $0x20] sm:$0xff]  ;;  %v1494_v39 = vld [vmem:[%s1862_s4 + $0x28] sm:$0xff]  ;;  %v639_v40 = vld [vmem:[%s1867_s9 + $0x58] sm:$0xff] }
  0x94   : > { %570 = vmatpush.msra.mxu0 %v1458_v28  ;;  %649 = vmatpush.msra.mxu2 %v642_v35  ;;  %v1502_v41 = vld [vmem:[%s1862_s4 + $0x18] sm:$0xff]  ;;  %v638_v43 = vld [vmem:[%s1867_s9 + $0x50] sm:$0xff]  ;;  %v637_v47 = vld [vmem:[%s1867_s9 + $0x48] sm:$0xff] }
  0x95   : > { %1118 = vmatmul.msk.f32.vlgmr.msra.gmra.mxu0 %vm536_vm8, %v1426_v22  ;;  %v1512_v46 = vld [vmem:[%s1862_s4 + $0x10] sm:$0xff]  ;;  %v1521_v50 = vld [vmem:[%s1862_s4 + $0x8] sm:$0xff]  ;;  %v636_v51 = vld [vmem:[%s1867_s9 + $0x40] sm:$0xff] }
  0x96   : > { %650 = vmatpush.msra.mxu2 %v641_v36  ;;  %v1530_v54 = vld [vmem:[%s1862_s4] sm:$0xff]  ;;  %v635_v55 = vld [vmem:[%s1867_s9 + $0x38] sm:$0xff]  ;;  %v634_v58 = vld [vmem:[%s1867_s9 + $0x30] sm:$0xff] }
  0x97   : > { %v633_v61 = vld [vmem:[%s1867_s9 + $0x28] sm:$0xff]  ;;  %v632_v63 = vld [vmem:[%s1867_s9 + $0x20] sm:$0xff]  ;;  %v631_v1 = vld [vmem:[%s1867_s9 + $0x18] sm:$0xff] }
  0x98   : > { %651 = vmatpush.msra.mxu2 %v640_v37  ;;  %v630_v2 = vld [vmem:[%s1867_s9 + $0x10] sm:$0xff]  ;;  %v629_v3 = vld [vmem:[%s1867_s9 + $0x8] sm:$0xff]  ;;  %v628_v4 = vld [vmem:[%s1867_s9] sm:$0xff] }
  0x99   : > { %v686_v5 = vld [vmem:[%s1869_s11 + $0x78] sm:$0xff]  ;;  %v685_v6 = vld [vmem:[%s1869_s11 + $0x70] sm:$0xff]  ;;  %v684_v7 = vld [vmem:[%s1869_s11 + $0x68] sm:$0xff] }
  0x9a   : > { %652 = vmatpush.msra.mxu2 %v639_v40  ;;  %v683_v8 = vld [vmem:[%s1869_s11 + $0x60] sm:$0xff]  ;;  %v682_v11 = vld [vmem:[%s1869_s11 + $0x58] sm:$0xff]  ;;  %v676_v34 = vld [vmem:[%s1869_s11 + $0x28] sm:$0xff] }
  0x9b   : > { %v675_v35 = vld [vmem:[%s1869_s11 + $0x20] sm:$0xff]  ;;  %v674_v40 = vld [vmem:[%s1869_s11 + $0x18] sm:$0xff] }
  0x9c   : > { %653 = vmatpush.msra.mxu2 %v638_v43 }
  0x9d   : > { %1119 = vmatmul.msk.f32.gmra.mxu0 %vm536_vm8, %v1444_v26 }
  0x9e   : > { %654 = vmatpush.msra.mxu2 %v637_v47  ;;  %v1217_v47 = vld [vmem:[%s1868_s10] ss:$0 sm:$0xff] }
  0xa0   : > { %655 = vmatpush.msra.mxu2 %v636_v51 }
  0xa2   : > { %656 = vmatpush.msra.mxu2 %v635_v55 }
  0xa4   : > { %657 = vmatpush.msra.mxu2 %v634_v58 }
  0xa5   : > { %1120 = vmatmul.msk.f32.gmra.mxu0 %vm536_vm8, %v1421_v21 }
  0xa6   : > { %658 = vmatpush.msra.mxu2 %v633_v61 }
  0xa8   : > { %659 = vmatpush.msra.mxu2 %v632_v63  ;;  %v790_v63 = vld [vmem:[%s1871_s13 + $0x50] sm:$0xff] }
  0xaa   : > { %660 = vmatpush.msra.mxu2 %v631_v1 }
  0xac   : > { %661 = vmatpush.msra.mxu2 %v630_v2  ;;  %v789_v2 = vld [vmem:[%s1871_s13 + $0x48] sm:$0xff] }
  0xad   : > { %1121 = vmatmul.msk.f32.gmra.mxu0 %vm536_vm8, %v1439_v25 }
  0xae   : > { %662 = vmatpush.msra.mxu2 %v629_v3 }
  0xb0   : > { %663 = vmatpush.msra.mxu2 %v628_v4 }
  0xb5   : > { %1122 = vmatmul.msk.f32.gmra.mxu0 %vm536_vm8, %v1399_v16 }
  0xbd   : > { %1123 = vmatmul.msk.f32.gmra.mxu0 %vm536_vm8, %v1408_v18 }
 0x112   : > { %v572_v29 = vpop.f32.mrf.mxu0 }
 0x113   : > { %v573_v59 = vadd.f32 %v572_v29, %v1530_v54  ;;  %v681_v29 = vld [vmem:[%s1869_s11 + $0x50] sm:$0xff] }
 0x115   : > { %v590_v0 = vmax.f32 %v573_v59, 0.0 }
 0x11a   : > { %v575_v30 = vpop.f32.mrf.mxu0 }
 0x11b   : > { %v576_v56 = vadd.f32 %v575_v30, %v1521_v50  ;;  %v680_v30 = vld [vmem:[%s1869_s11 + $0x48] sm:$0xff] }
 0x11d   : > { %v591_v62 = vmax.f32 %v576_v56, 0.0 }
 0x122   : > { %v578_v31 = vpop.f32.mrf.mxu0 }
 0x123   : > { %v579_v52 = vadd.f32 %v578_v31, %v1512_v46  ;;  %v679_v31 = vld [vmem:[%s1869_s11 + $0x40] sm:$0xff] }
 0x125   : > { %v592_v60 = vmax.f32 %v579_v52, 0.0 }
 0x12a   : > { %v581_v32 = vpop.f32.mrf.mxu0 }
 0x12b   : > { %v582_v48 = vadd.f32 %v581_v32, %v1502_v41  ;;  %v678_v32 = vld [vmem:[%s1869_s11 + $0x38] sm:$0xff] }
 0x12d   : > { %v593_v57 = vmax.f32 %v582_v48, 0.0 }
 0x132   : > { %v584_v33 = vpop.f32.mrf.mxu0 }
 0x133   : > { %v585_v44 = vadd.f32 %v584_v33, %v1489_v38  ;;  %v677_v33 = vld [vmem:[%s1869_s11 + $0x30] sm:$0xff] }
 0x135   : > { %v594_v53 = vmax.f32 %v585_v44, 0.0 }
 0x13a   : > { %v587_v42 = vpop.f32.mrf.mxu0 }
 0x13b   : > { %v588_v45 = vadd.f32 %v587_v42, %v1494_v39  ;;  %v673_v42 = vld [vmem:[%s1869_s11 + $0x10] sm:$0xff] }
 0x13d   : > { %v595_v49 = vmax.f32 %v588_v45, 0.0  ;;  %v671_v45 = vld [vmem:[%s1869_s11] sm:$0xff] }
 0x13f   : > { %613 = vmatpush.msra.mxu3 %v595_v49 }
 0x141   : > { %614 = vmatpush.msra.mxu3 %v594_v53  ;;  %v1218_v53 = vld [vmem:[%s1870_s12] ss:$0 sm:$0xff] }
 0x143   : > { %615 = vmatpush.msra.mxu3 %v593_v57 }
 0x145   : > { %616 = vmatpush.msra.mxu3 %v592_v60 }
 0x147   : > { %617 = vmatpush.msra.mxu3 %v591_v62 }
 0x149   : > { %618 = vmatpush.msra.mxu3 %v590_v0 }
 0x14a   : > { %1124 = vmatmul.msk.f32.vlgmr.msra.gmra.mxu3 %vm596_vm9, %v1385_v12 }
 0x14b   : > { %691 = vmatpush.msrb.mxu3 %v686_v5  ;;  %v788_v5 = vld [vmem:[%s1871_s13 + $0x40] sm:$0xff] }
 0x14d   : > { %692 = vmatpush.msrb.mxu3 %v685_v6 }
 0x14f   : > { %693 = vmatpush.msrb.mxu3 %v684_v7 }
 0x151   : > { %694 = vmatpush.msrb.mxu3 %v683_v8  ;;  %v786_v8 = vld [vmem:[%s1871_s13 + $0x30] sm:$0xff] }
 0x152   : > { %1125 = vmatmul.msk.f32.gmra.mxu3 %vm596_vm9, %v1388_v13 }
 0x153   : > { %695 = vmatpush.msrb.mxu3 %v682_v11 }
 0x155   : > { %696 = vmatpush.msrb.mxu3 %v681_v29  ;;  %v785_v29 = vld [vmem:[%s1871_s13 + $0x28] sm:$0xff] }
 0x157   : > { %697 = vmatpush.msrb.mxu3 %v680_v30 }
 0x159   : > { %698 = vmatpush.msrb.mxu3 %v679_v31 }
 0x15b   : > { %699 = vmatpush.msrb.mxu3 %v678_v32  ;;  %v782_v32 = vld [vmem:[%s1871_s13 + $0x10] sm:$0xff] }
 0x15d   : > { %700 = vmatpush.msrb.mxu3 %v677_v33  ;;  %v781_v33 = vld [vmem:[%s1871_s13 + $0x8] sm:$0xff] }
 0x15f   : > { %701 = vmatpush.msrb.mxu3 %v676_v34  ;;  %v780_v34 = vld [vmem:[%s1871_s13] sm:$0xff] }
 0x161   : > { %702 = vmatpush.msrb.mxu3 %v675_v35 }
 0x163   : > { %703 = vmatpush.msrb.mxu3 %v674_v40 }
 0x165   : > { %704 = vmatpush.msrb.mxu3 %v673_v42  ;;  %v1219_v42 = vld [vmem:[%s1872_s14] ss:$0 sm:$0xff] }
 0x1cd   : > { %v620_v36 = vpop.f32.mrf.mxu3 }
 0x1ce   : > { %v626_v37 = vadd.f32 %v620_v36, %v1458_v28  ;;  %v672_v28 = vld [vmem:[%s1869_s11 + $0x8] sm:$0xff] }
 0x1cf   : > { %705 = vmatpush.msrb.mxu3 %v672_v28 }
 0x1d0   : > { %664 = vmatmul.f32.vlgmr.msra.gmra.mxu2 %v626_v37 }
 0x1d1   : > { %706 = vmatpush.msrb.mxu3 %v671_v45 }
 0x1d5   : > { %v623_v43 = vpop.f32.mrf.mxu3 }
 0x1d6   : > { %v627_v44 = vadd.f32 %v623_v43, %v1453_v27 }
 0x1d8   : > { %667 = vmatmul.f32.gmra.mxu2 %v627_v44 }
 0x253   : > { %v665_v48 = vpop.f32.mrf.mxu2 }
 0x254   : > { %v666_v49 = vadd.f32 %v1217_v47, %v665_v48 }
 0x256   : > { %707 = vmatmul.f32.vlgmr.msrb.gmra.mxu3 %v666_v49 }
 0x25b   : > { %v668_v51 = vpop.f32.mrf.mxu2 }
 0x25c   : > { %v669_v27 = vadd.f32 %v1217_v47, %v668_v51 }
 0x25e   : > { %710 = vmatmul.f32.gmra.mxu3 %v669_v27 }
 0x2d9   : > { %v708_v52 = vpop.f32.mrf.mxu3 }
 0x2da   : > { %v1620_v57 = vadd.f32 %v1218_v53, %v708_v52 }
 0x2e1   : > { %v711_v55 = vpop.f32.mrf.mxu3 }
 0x2e2   : > { %v1618_v56 = vadd.f32 %v1218_v53, %v711_v55 }
 0x2e4   : > { %728 = vmatpush.msra.mxu1 %v1618_v56 }
 0x2e6   : > { %729 = vmatpush.msra.mxu1 %v1620_v57 }
 0x2e7   : > { %1126 = vmatmul.msk.f32.vlgmr.msra.gmra.mxu1 %vm536_vm8, %v1426_v22 }
 0x2ef   : > { %1127 = vmatmul.msk.f32.gmra.mxu1 %vm536_vm8, %v1444_v26  ;;  %v795_v26 = vld [vmem:[%s1871_s13 + $0x78] sm:$0xff] }
 0x2f0   : > { %800 = vmatpush.msrb.mxu0 %v795_v26  ;;  %1153 = vmatpush.msrb.mxu1 %v795_v26 }
 0x2f7   : > { %1128 = vmatmul.msk.f32.gmra.mxu1 %vm536_vm8, %v1421_v21  ;;  %v794_v21 = vld [vmem:[%s1871_s13 + $0x70] sm:$0xff] }
 0x2f8   : > { %801 = vmatpush.msrb.mxu0 %v794_v21  ;;  %1154 = vmatpush.msrb.mxu1 %v794_v21 }
 0x2ff   : > { %1129 = vmatmul.msk.f32.gmra.mxu1 %vm536_vm8, %v1439_v25  ;;  %v791_v25 = vld [vmem:[%s1871_s13 + $0x58] sm:$0xff] }
 0x307   : > { %1130 = vmatmul.msk.f32.gmra.mxu1 %vm536_vm8, %v1399_v16  ;;  %v793_v16 = vld [vmem:[%s1871_s13 + $0x68] sm:$0xff] }
 0x308   : > { %802 = vmatpush.msrb.mxu0 %v793_v16  ;;  %1155 = vmatpush.msrb.mxu1 %v793_v16 }
 0x30f   : > { %1131 = vmatmul.msk.f32.gmra.mxu1 %vm536_vm8, %v1408_v18  ;;  %v792_v18 = vld [vmem:[%s1871_s13 + $0x60] sm:$0xff] }
 0x310   : > { %803 = vmatpush.msrb.mxu0 %v792_v18  ;;  %1156 = vmatpush.msrb.mxu1 %v792_v18 }
 0x312   : > { %804 = vmatpush.msrb.mxu0 %v791_v25  ;;  %1157 = vmatpush.msrb.mxu1 %v791_v25 }
 0x314   : > { %805 = vmatpush.msrb.mxu0 %v790_v63  ;;  %1158 = vmatpush.msrb.mxu1 %v790_v63 }
 0x316   : > { %806 = vmatpush.msrb.mxu0 %v789_v2  ;;  %1159 = vmatpush.msrb.mxu1 %v789_v2 }
 0x318   : > { %807 = vmatpush.msrb.mxu0 %v788_v5  ;;  %1160 = vmatpush.msrb.mxu1 %v788_v5 }
 0x364   : > { %v731_v58 = vpop.f32.mrf.mxu1 }
 0x36c   : > { %v734_v59 = vpop.f32.mrf.mxu1 }
 0x36d   : > { %v735_v7 = vadd.f32 %v734_v59, %v1521_v50  ;;  %v784_v50 = vld [vmem:[%s1871_s13 + $0x20] sm:$0xff] }
 0x36f   : > { %v750_v30 = vmax.f32 %v735_v7, 0.0 }
 0x374   : > { %v737_v60 = vpop.f32.mrf.mxu1 }
 0x375   : > { %v738_v6 = vadd.f32 %v737_v60, %v1512_v46  ;;  %v732_v46 = vadd.f32 %v731_v58, %v1530_v54  ;;  %v783_v54 = vld [vmem:[%s1871_s13 + $0x18] sm:$0xff] }
 0x377   : > { %v751_v11 = vmax.f32 %v738_v6, 0.0  ;;  %v749_v31 = vmax.f32 %v732_v46, 0.0 }
 0x37c   : > { %v740_v61 = vpop.f32.mrf.mxu1 }
 0x37d   : > { %v741_v3 = vadd.f32 %v740_v61, %v1502_v41 }
 0x37f   : > { %v752_v41 = vmax.f32 %v741_v3, 0.0 }
 0x384   : > { %v743_v22 = vpop.f32.mrf.mxu1 }
 0x385   : > { %v744_v0 = vadd.f32 %v743_v22, %v1489_v38 }
 0x387   : > { %v753_v38 = vmax.f32 %v744_v0, 0.0 }
 0x38c   : > { %v746_v62 = vpop.f32.mrf.mxu1 }
 0x38d   : > { %v747_v1 = vadd.f32 %v746_v62, %v1494_v39  ;;  %v787_v39 = vld [vmem:[%s1871_s13 + $0x38] sm:$0xff] }
 0x38e   : > { %808 = vmatpush.msrb.mxu0 %v787_v39  ;;  %1161 = vmatpush.msrb.mxu1 %v787_v39 }
 0x38f   : > { %v754_v4 = vmax.f32 %v747_v1, 0.0 }
 0x390   : > { %809 = vmatpush.msrb.mxu0 %v786_v8  ;;  %1162 = vmatpush.msrb.mxu1 %v786_v8 }
 0x391   : > { %765 = vmatpush.msrb.mxu2 %v754_v4 }
 0x392   : > { %810 = vmatpush.msrb.mxu0 %v785_v29  ;;  %1163 = vmatpush.msrb.mxu1 %v785_v29 }
 0x393   : > { %766 = vmatpush.msrb.mxu2 %v753_v38 }
 0x394   : > { %811 = vmatpush.msrb.mxu0 %v784_v50  ;;  %1164 = vmatpush.msrb.mxu1 %v784_v50 }
 0x395   : > { %767 = vmatpush.msrb.mxu2 %v752_v41 }
 0x396   : > { %812 = vmatpush.msrb.mxu0 %v783_v54  ;;  %1165 = vmatpush.msrb.mxu1 %v783_v54 }
 0x397   : > { %768 = vmatpush.msrb.mxu2 %v751_v11 }
 0x398   : > { %813 = vmatpush.msrb.mxu0 %v782_v32  ;;  %1166 = vmatpush.msrb.mxu1 %v782_v32 }
 0x399   : > { %769 = vmatpush.msrb.mxu2 %v750_v30 }
 0x39a   : > { %814 = vmatpush.msrb.mxu0 %v781_v33  ;;  %1167 = vmatpush.msrb.mxu1 %v781_v33 }
 0x39b   : > { %770 = vmatpush.msrb.mxu2 %v749_v31 }
 0x39c   : > { %1132 = vmatmul.msk.f32.vlgmr.msrb.gmra.mxu2 %vm596_vm9, %v1385_v12  ;;  %815 = vmatpush.msrb.mxu0 %v780_v34 }
 0x39d   : > { %1168 = vmatpush.msrb.mxu1 %v780_v34 }
 0x3a4   : > { %1133 = vmatmul.msk.f32.gmra.mxu2 %vm596_vm9, %v1388_v13 }
 0x41f   : > { %v772_v35 = vpop.f32.mrf.mxu2 }
 0x420   : > { %v778_v36 = vadd.f32 %v772_v35, %v1620_v57 }
 0x422   : > { %816 = vmatmul.f32.vlgmr.msrb.gmra.mxu0 %v778_v36 }
 0x427   : > { %v775_v37 = vpop.f32.mrf.mxu2 }
 0x428   : > { %v779_v40 = vadd.f32 %v775_v37, %v1618_v56 }
 0x42a   : > { %819 = vmatmul.f32.vlgmr.msrb.gmra.mxu1 %v779_v40 }
 0x49f   : > { %v817_v43 = vpop.f32.mrf.mxu0 }
 0x4a0   : > { %v818_v44 = vadd.f32 %v1219_v42, %v817_v43 }
 0x4a2   : > { %823 = vst [vmem:[%s1447_s23] sm:$0xff] %v818_v44 }
 0x4a7   : > { %v820_v28 = vpop.f32.mrf.mxu1 }
 0x4a8   : > { %v821_v45 = vadd.f32 %v1219_v42, %v820_v28 }
 0x4aa   : > { %824 = vst [vmem:[%s1447_s23 + $0x8] sm:$0xff] %v821_v45 }
 0x4ab PF: > { %p1134_p8 = scmp.ne.s32.totalorder %s1341_s21, 1 }
 0x4ad   : > { %828 = sbr.rel (%p1134_p8) target bundleno = 1894 (0x766), region = 88 }
 0x4b2   : > { %v1248_v47 = vmov 1.0   ;;  %vm835_vm10 = vcmask 392192   ;;  %v866_v15 = vld [vmem:[%s1860_s2 + $0x8] sm:$0xff]  ;;  %v865_v17 = vld [vmem:[%s1860_s2] sm:$0xff]  ;;  %v912_v19 = vld [vmem:[%s1863_s5 + $0x78] sm:$0xff]  ;;  %vm829_vm11 = vcmp.eq.s32.totalorder %v1379_v9, %v1390_v14  ;;  %v1249_v53 = vmov 0.0  }
 0x4b3   : > { %1137 = vmatpush.msk.msra.mxu0 %vm500_vm3, %v1248_v47  ;;  %888 = vmatpush.msra.mxu1 %v866_v15  ;;  %v909_v20 = vld [vmem:[%s1863_s5 + $0x60] sm:$0xff]  ;;  %v908_v23 = vld [vmem:[%s1863_s5 + $0x58] sm:$0xff]  ;;  %v907_v24 = vld [vmem:[%s1863_s5 + $0x50] sm:$0xff]  ;;  %v1135_v55 = vsel %vm829_vm11, 1.0, %v1249_v53  ;;  %vm867_vm12 = vcmask 130048   ;;  %vm830_vm13 = vcmp.eq.s32.totalorder %v1382_v10, %v1390_v14 }
 0x4b4   : > { %917 = vmatpush.msra.mxu2 %v912_v19  ;;  %v906_v48 = vld [vmem:[%s1863_s5 + $0x48] sm:$0xff]  ;;  %v905_v49 = vld [vmem:[%s1863_s5 + $0x40] sm:$0xff]  ;;  %v904_v51 = vld [vmem:[%s1863_s5 + $0x38] sm:$0xff]  ;;  %v1136_v61 = vsel %vm830_vm13, 1.0, %v1249_v53 }
 0x4b5   : > { %1138 = vmatpush.msk.msra.mxu0 %vm499_vm2, %v1248_v47  ;;  %889 = vmatpush.msra.mxu1 %v865_v17  ;;  %v903_v27 = vld [vmem:[%s1863_s5 + $0x30] sm:$0xff]  ;;  %v902_v52 = vld [vmem:[%s1863_s5 + $0x28] sm:$0xff]  ;;  %v901_v56 = vld [vmem:[%s1863_s5 + $0x20] sm:$0xff] }
 0x4b6   : > { %v900_v58 = vld [vmem:[%s1863_s5 + $0x18] sm:$0xff]  ;;  %v899_v59 = vld [vmem:[%s1863_s5 + $0x10] sm:$0xff]  ;;  %v898_v60 = vld [vmem:[%s1863_s5 + $0x8] sm:$0xff] }
 0x4b7   : > { %1139 = vmatpush.msk.msra.mxu0 %vm498_vm6, %v1248_v47  ;;  %v897_v10 = vld [vmem:[%s1863_s5] sm:$0xff]  ;;  %v984_v16 = vld [vmem:[%s1865_s7 + $0x78] sm:$0xff]  ;;  %v983_v18 = vld [vmem:[%s1865_s7 + $0x70] sm:$0xff] }
 0x4b8   : > { %989 = vmatpush.msrb.mxu1 %v984_v16  ;;  %v982_v25 = vld [vmem:[%s1865_s7 + $0x68] sm:$0xff]  ;;  %v981_v62 = vld [vmem:[%s1865_s7 + $0x60] sm:$0xff]  ;;  %v980_v63 = vld [vmem:[%s1865_s7 + $0x58] sm:$0xff] }
 0x4b9   : > { %1140 = vmatpush.msk.msra.mxu0 %vm497_vm4, %v1248_v47  ;;  %v979_v1 = vld [vmem:[%s1865_s7 + $0x50] sm:$0xff]  ;;  %v1220_v2 = vld [vmem:[%s1864_s6] ss:$0 sm:$0xff]  ;;  %v978_v3 = vld [vmem:[%s1865_s7 + $0x48] sm:$0xff] }
 0x4ba   : > { %990 = vmatpush.msrb.mxu1 %v983_v18  ;;  %v977_v4 = vld [vmem:[%s1865_s7 + $0x40] sm:$0xff]  ;;  %v976_v6 = vld [vmem:[%s1865_s7 + $0x38] sm:$0xff]  ;;  %v975_v7 = vld [vmem:[%s1865_s7 + $0x30] sm:$0xff] }
 0x4bb   : > { %1141 = vmatpush.msk.msra.mxu0 %vm496_vm7, %v1248_v47  ;;  %v974_v46 = vld [vmem:[%s1865_s7 + $0x28] sm:$0xff]  ;;  %v973_v29 = vld [vmem:[%s1865_s7 + $0x20] sm:$0xff]  ;;  %v972_v50 = vld [vmem:[%s1865_s7 + $0x18] sm:$0xff] }
 0x4bc   : > { %991 = vmatpush.msrb.mxu1 %v982_v25  ;;  %v971_v31 = vld [vmem:[%s1865_s7 + $0x10] sm:$0xff]  ;;  %v970_v54 = vld [vmem:[%s1865_s7 + $0x8] sm:$0xff]  ;;  %v969_v32 = vld [vmem:[%s1865_s7] sm:$0xff] }
 0x4bd   : > { %1142 = vmatpush.msk.msra.mxu0 %vm495_vm5, %v1248_v47  ;;  %v1221_v35 = vld [vmem:[%s1866_s8] ss:$0 sm:$0xff] }
 0x4be   : > { %1143 = vmatmul.msk.f32.vlgmr.msra.gmra.mxu0 %vm835_vm10, %v1385_v12  ;;  %v911_v12 = vld [vmem:[%s1863_s5 + $0x70] sm:$0xff]  ;;  %992 = vmatpush.msrb.mxu1 %v981_v62 }
 0x4bf   : > { %918 = vmatpush.msra.mxu2 %v911_v12 }
 0x4c0   : > { %993 = vmatpush.msrb.mxu1 %v980_v63 }
 0x4c2   : > { %994 = vmatpush.msrb.mxu1 %v979_v1 }
 0x4c4   : > { %995 = vmatpush.msrb.mxu1 %v978_v3 }
 0x4c6   : > { %1144 = vmatmul.msk.f32.gmra.mxu0 %vm835_vm10, %v1388_v13  ;;  %v910_v13 = vld [vmem:[%s1863_s5 + $0x68] sm:$0xff]  ;;  %996 = vmatpush.msrb.mxu1 %v977_v4 }
 0x4c7   : > { %919 = vmatpush.msra.mxu2 %v910_v13 }
 0x4c8   : > { %997 = vmatpush.msrb.mxu1 %v976_v6 }
 0x4c9   : > { %920 = vmatpush.msra.mxu2 %v909_v20 }
 0x4ca   : > { %998 = vmatpush.msrb.mxu1 %v975_v7 }
 0x4cb   : > { %921 = vmatpush.msra.mxu2 %v908_v23 }
 0x4cc   : > { %999 = vmatpush.msrb.mxu1 %v974_v46 }
 0x4cd   : > { %922 = vmatpush.msra.mxu2 %v907_v24 }
 0x4ce   : > { %1000 = vmatpush.msrb.mxu1 %v973_v29 }
 0x4cf   : > { %923 = vmatpush.msra.mxu2 %v906_v48 }
 0x4d0   : > { %1001 = vmatpush.msrb.mxu1 %v972_v50 }
 0x4d1   : > { %924 = vmatpush.msra.mxu2 %v905_v49 }
 0x4d2   : > { %1002 = vmatpush.msrb.mxu1 %v971_v31 }
 0x4d3   : > { %925 = vmatpush.msra.mxu2 %v904_v51 }
 0x4d4   : > { %1003 = vmatpush.msrb.mxu1 %v970_v54 }
 0x4d5   : > { %926 = vmatpush.msra.mxu2 %v903_v27 }
 0x4d6   : > { %1004 = vmatpush.msrb.mxu1 %v969_v32 }
 0x4d7   : > { %927 = vmatpush.msra.mxu2 %v902_v52 }
 0x4d9   : > { %928 = vmatpush.msra.mxu2 %v901_v56 }
 0x4db   : > { %929 = vmatpush.msra.mxu2 %v900_v58 }
 0x4dd   : > { %930 = vmatpush.msra.mxu2 %v899_v59 }
 0x4df   : > { %931 = vmatpush.msra.mxu2 %v898_v60 }
 0x4e1   : > { %932 = vmatpush.msra.mxu2 %v897_v10 }
 0x53b   : > { %v859_v57 = vpop.f32.mrf.mxu0 }
 0x53c   : > { %v860_v9 = vadd.f32 %v1135_v55, %v859_v57 }
 0x53e   : > { %1145 = vmatmul.msk.f32.vlgmr.msra.gmra.mxu1 %vm867_vm12, %v860_v9 }
 0x543   : > { %v862_v22 = vpop.f32.mrf.mxu0 }
 0x544   : > { %v863_v26 = vadd.f32 %v1136_v61, %v862_v22 }
 0x546   : > { %1146 = vmatmul.msk.f32.gmra.mxu1 %vm867_vm12, %v863_v26 }
 0x5bb   : > { %v891_v14 = vpop.f32.mrf.mxu1 }
 0x5bc   : > { %933 = vmatmul.f32.vlgmr.msra.gmra.mxu2 %v891_v14 }
 0x5c3   : > { %v894_v21 = vpop.f32.mrf.mxu1 }
 0x5c4   : > { %936 = vmatmul.f32.gmra.mxu2 %v894_v21 }
 0x63f   : > { %v934_v0 = vpop.f32.mrf.mxu2 }
 0x640   : > { %v935_v5 = vadd.f32 %v1220_v2, %v934_v0 }
 0x642   : > { %v942_v8 = vmul.f32 0.01, %v935_v5  ;;  %vm940_vm15 = vcmp.gt.f32.partialorder %v935_v5, 0.0 }
 0x644   : > { %v944_v30 = vsel %vm940_vm15, %v935_v5, %v942_v8 }
 0x647   : > { %v937_v38 = vpop.f32.mrf.mxu2 }
 0x648   : > { %v938_v39 = vadd.f32 %v1220_v2, %v937_v38 }
 0x64a   : > { %vm941_vm14 = vcmp.gt.f32.partialorder %v938_v39, 0.0  ;;  %v943_v41 = vmul.f32 0.01, %v938_v39 }
 0x64c   : > { %v945_v11 = vsel %vm941_vm14, %v938_v39, %v943_v41 }
 0x64d   : > { %960 = vmatpush.msra.mxu3 %v945_v11 }
 0x64f   : > { %961 = vmatpush.msra.mxu3 %v944_v30 }
 0x650   : > { %1147 = vmatmul.msk.f32.vlgmr.msra.gmra.mxu3 %vm867_vm12, %v860_v9 }
 0x651   : > { %1169 = vmatpush.msrb.mxu3 %v984_v16 }
 0x653   : > { %1170 = vmatpush.msrb.mxu3 %v983_v18 }
 0x655   : > { %1171 = vmatpush.msrb.mxu3 %v982_v25 }
 0x657   : > { %1172 = vmatpush.msrb.mxu3 %v981_v62 }
 0x658   : > { %1148 = vmatmul.msk.f32.gmra.mxu3 %vm867_vm12, %v863_v26 }
 0x659   : > { %1173 = vmatpush.msrb.mxu3 %v980_v63 }
 0x65b   : > { %1174 = vmatpush.msrb.mxu3 %v979_v1 }
 0x65d   : > { %1175 = vmatpush.msrb.mxu3 %v978_v3 }
 0x65f   : > { %1176 = vmatpush.msrb.mxu3 %v977_v4 }
 0x661   : > { %1177 = vmatpush.msrb.mxu3 %v976_v6 }
 0x663   : > { %1178 = vmatpush.msrb.mxu3 %v975_v7 }
 0x665   : > { %1179 = vmatpush.msrb.mxu3 %v974_v46 }
 0x667   : > { %1180 = vmatpush.msrb.mxu3 %v973_v29 }
 0x669   : > { %1181 = vmatpush.msrb.mxu3 %v972_v50 }
 0x66b   : > { %1182 = vmatpush.msrb.mxu3 %v971_v31 }
 0x66d   : > { %1183 = vmatpush.msrb.mxu3 %v970_v54 }
 0x66f   : > { %1184 = vmatpush.msrb.mxu3 %v969_v32 }
 0x6d3   : > { %v963_v33 = vpop.f32.mrf.mxu3 }
 0x6d4   : > { %1005 = vmatmul.f32.vlgmr.msrb.gmra.mxu1 %v963_v33 }
 0x6db   : > { %v966_v34 = vpop.f32.mrf.mxu3 }
 0x6dc   : > { %1008 = vmatmul.f32.vlgmr.msrb.gmra.mxu3 %v966_v34 }
 0x751   : > { %v1006_v36 = vpop.f32.mrf.mxu1 }
 0x752   : > { %v1007_v37 = vadd.f32 %v1221_v35, %v1006_v36 }
 0x754   : > { %vm1012_vm0 = vcmp.gt.f32.partialorder %v1007_v37, 0.0  ;;  %v1014_v40 = vmul.f32 0.01, %v1007_v37 }
 0x756   : > { %v1016_v42 = vsel %vm1012_vm0, %v1007_v37, %v1014_v40 }
 0x757   : > { %1018 = vst [vmem:[%s1447_s23] sm:$0xff] %v1016_v42 }
 0x75f   : > { %v1009_v43 = vpop.f32.mrf.mxu3 }
 0x760   : > { %v1010_v44 = vadd.f32 %v1221_v35, %v1009_v43 }
 0x762   : > { %vm1013_vm1 = vcmp.gt.f32.partialorder %v1010_v44, 0.0  ;;  %v1015_v28 = vmul.f32 0.01, %v1010_v44 }
 0x764   : > { %v1017_v45 = vsel %vm1013_vm1, %v1010_v44, %v1015_v28 }
 0x765   : > { %1019 = vst [vmem:[%s1447_s23 + $0x8] sm:$0xff] %v1017_v45 }
 0x766 PF: > { %1026 = sbr.rel (!%p1352_p4) target bundleno = 1902 (0x76e), region = 92  ;;  %s1150_s27 = sshll.u32 (%p1352_p4), %s1341_s21, 3  ;;  %v1059_v47 = vld [vmem:[%s1447_s23] sm:$0xff] (%p1352_p4) }
 0x767   : > { %s1028_s29 = scalar_lea.vmem (%p1352_p4), %s1873_s15, %s1150_s27 }
 0x768   : > { %1060 = vst [vmem:[%s1028_s29] sm:$0xff] (%p1352_p4), %v1059_v47 }
 0x76c   : > { %v1061_v15 = vld [vmem:[%s1447_s23 + $0x8] sm:$0xff] }
 0x76d   : > { %1062 = vst [vmem:[%s1028_s29 + $0x10] sm:$0xff] %v1061_v15 }
 0x76e PF: > { %p22_p9 = scmp.ge.s32.totalorder %s1343_s22, 4   ;;  %s1877_s18 = smov %s1240_s19 }
 0x76f   : > { %s1878_s19 = smov %s1350_s25  ;;  %s1879_s20 = smov %s1343_s22 }
 0x770   :  { %24 = sbr.rel (!%p22_p9) target bundleno = 4 (0x4), region = 153 }

</bundles_post_ra>
